<compile_context>
chip_gen: v5e
topology: v5e:2x2
jax: 0.10.0
libtpu: 0.0.40
codegen_flags: <defaults>
</compile_context>

<pallas_src>
import functools

import jax
import jax.numpy as jnp
import numpy as np
from jax import lax
from jax.experimental import pallas as pl
from jax.experimental.pallas import tpu as pltpu


# ---------------------------------------------------------------------------
# Parameter construction (deterministic, synthetic — mirrors Block.__init__)
# ---------------------------------------------------------------------------
def make_params(key, C):
    ks = jax.random.split(key, 8)

    def w(k, shape, scale=0.2):
        return (jax.random.normal(k, shape, jnp.float32) * scale).astype(jnp.float32)

    return dict(
        w1=w(ks[0], (C, C, 1, 1)), b1=w(ks[1], (C,), 0.1),   # conv1: 1x1
        w2=w(ks[2], (C, C, 1, 1)), b2=w(ks[3], (C,), 0.1),   # conv2: 1x1
        w3=w(ks[4], (C, C, 3, 3)), b3=w(ks[5], (C,), 0.1),   # conv3: 3x3, pad 1
        w4=w(ks[6], (C, C, 1, 1)), b4=w(ks[7], (C,), 0.1),   # conv4: 1x1
    )


# ---------------------------------------------------------------------------
# Pure-JAX reference (matches PyTorch semantics exactly, NCHW / OIHW)
# ---------------------------------------------------------------------------
def _conv_ref(x, w, b, padding):
    y = lax.conv_general_dilated(
        x, w, window_strides=(1, 1), padding=padding,
        dimension_numbers=("NCHW", "OIHW", "NCHW"))
    return y + b.reshape(1, -1, 1, 1)


def block_ref(x, p):
    x1 = _conv_ref(x, p["w1"], p["b1"], "VALID")
    x0 = jax.nn.relu(_conv_ref(x, p["w2"], p["b2"], "VALID"))
    x0 = jax.nn.relu(_conv_ref(x0, p["w3"], p["b3"], "SAME"))
    x0 = jax.nn.relu(_conv_ref(x0, p["w4"], p["b4"], "VALID"))
    return jax.nn.relu(x0 + x1)


# ---------------------------------------------------------------------------
# Pallas kernel — single invocation, whole batch, (C, B*HW) layout
# ---------------------------------------------------------------------------
def _block_kernel(x_ref, w1_ref, b1_ref, w2_ref, b2_ref, w3_ref, b3_ref,
                  w4_ref, b4_ref, mask_ref, o_ref, stacked_ref, *, B, H, W):
    HW = H * W
    N = B * HW
    C = w1_ref.shape[0]

    # Fold batch into the lane axis: (B, C, HW) -> (C, B*HW).
    # Lane-aligned concat (HW is a multiple of 128); stays on-chip.
    xm = jnp.concatenate([x_ref[b] for b in range(B)], axis=-1)        # (C, N)

    # conv1 (1x1) — residual branch:  W1 (C,C) @ X (C,N)
    x1 = jnp.dot(w1_ref[...], xm,
                 preferred_element_type=jnp.float32) + b1_ref[...]

    # conv2 (1x1) + relu
    x0 = jnp.maximum(
        jnp.dot(w2_ref[...], xm,
                preferred_element_type=jnp.float32) + b2_ref[...], 0.0)

    # conv3 (3x3, padding=1): write the 9 lane-rolled, zero-masked taps into a
    # VMEM scratch (one 8-row slice each — low vreg pressure, no giant concat),
    # then ONE (C, 9C) @ (9C, N) matmul fed from the scratch ref.
    # Masks are precomputed per destination column in the wrapper; a valid tap
    # can never wrap the flattened axis nor bleed across the batch seam, and an
    # invalid tap is zeroed, so the roll construction matches zero padding.
    t = 0
    for dy in (-1, 0, 1):
        for dx in (-1, 0, 1):
            s = dy * W + dx                      # shift in flattened spatial idx
            rolled = x0 if s == 0 else pltpu.roll(x0, shift=(-s) % N, axis=1)
            stacked_ref[pl.ds(t * C, C), :] = rolled * mask_ref[pl.ds(t, 1), :]
            t += 1

    x0 = jnp.maximum(
        jnp.dot(w3_ref[...], stacked_ref[...],
                preferred_element_type=jnp.float32) + b3_ref[...], 0.0)

    # conv4 (1x1) + relu
    x0 = jnp.maximum(
        jnp.dot(w4_ref[...], x0,
                preferred_element_type=jnp.float32) + b4_ref[...], 0.0)

    # residual add + relu, then unfold batch back to (B, C, HW)
    y = jnp.maximum(x0 + x1, 0.0)
    for b in range(B):
        o_ref[b] = y[:, b * HW:(b + 1) * HW]     # static, lane-aligned slice


def block_pallas(x_nchw, p):
    B, C, H, W = x_nchw.shape
    HW = H * W
    N = B * HW

    # Lane-dense layout requires per-image spatial extent to be a multiple of
    # 128 (pad HW in the wrapper if this ever fails — do not go misaligned).
    assert HW % 128 == 0, f"H*W={HW} must be a multiple of 128"

    # NCHW is already channel-major over a flat spatial axis: pure reshape,
    # no transposes in or out of the kernel.
    x3d = x_nchw.reshape(B, C, HW).astype(jnp.float32)

    w1 = p["w1"][:, :, 0, 0].astype(jnp.float32)              # (Cout, Cin)
    w2 = p["w2"][:, :, 0, 0].astype(jnp.float32)
    w4 = p["w4"][:, :, 0, 0].astype(jnp.float32)
    # (O, I, 3, 3) -> (O, KH, KW, I) -> (O, 9*I); column t*C + i <-> tap
    # t = ky*3 + kx = (dy+1)*3 + (dx+1) — matches the kernel's tap order.
    w3 = jnp.transpose(p["w3"], (0, 2, 3, 1)).reshape(C, 9 * C).astype(jnp.float32)
    b1 = p["b1"].reshape(C, 1).astype(jnp.float32)
    b2 = p["b2"].reshape(C, 1).astype(jnp.float32)
    b3 = p["b3"].reshape(C, 1).astype(jnp.float32)
    b4 = p["b4"].reshape(C, 1).astype(jnp.float32)

    # Precompute the nine zero-padding validity masks (host-side numpy):
    # mask[t, col] = 1.0 iff the 3x3 tap (dy,dx)=t lands inside the image for
    # the pixel at per-image position (col % HW).  Tiled across the batch.
    q = np.arange(HW)
    hh = q // W
    ww = q % W
    m_rows = []
    for dy in (-1, 0, 1):
        for dx in (-1, 0, 1):
            valid = ((hh + dy >= 0) & (hh + dy < H) &
                     (ww + dx >= 0) & (ww + dx < W))
            m_rows.append(valid.astype(np.float32))
    mask9 = jnp.asarray(np.tile(np.stack(m_rows, axis=0), (1, B)))     # (9, N)

    kernel = functools.partial(_block_kernel, B=B, H=H, W=W)
    vmem = pl.BlockSpec(memory_space=pltpu.MemorySpace.VMEM)

    # Advisory cost for XLA's scheduler: 4 matmuls (K = C,C,9C,C), tiny bytes.
    flops = 2 * C * (12 * C) * N
    bytes_accessed = (2 * B * C * HW * 4            # x in + out
                      + (3 * C * C + 9 * C * C + 4 * C) * 4   # weights + biases
                      + 9 * N * 4)                  # masks
    cost = pl.CostEstimate(flops=flops, transcendentals=0,
                           bytes_accessed=bytes_accessed)

    # Whole problem (< ~200 KiB incl. the (9C, N) scratch) lives in VMEM: no
    # grid, no per-step pipelining overhead.  Re-tile along N with BlockSpecs
    # (weights with a constant index_map) before scaling B*HW up — that also
    # re-enables a "parallel" split across v7x's two TensorCores.
    out3d = pl.pallas_call(
        kernel,
        out_shape=jax.ShapeDtypeStruct((B, C, HW), jnp.float32),
        in_specs=[vmem] * 10,
        out_specs=vmem,
        scratch_shapes=[pltpu.VMEM((9 * C, N), jnp.float32)],
        cost_estimate=cost,
    )(x3d, w1, b1, w2, b2, w3, b3, w4, b4, mask9)

    return out3d.reshape(B, C, H, W)   # free reshape back to NCHW


# ---------------------------------------------------------------------------
if __name__ == "__main__":
    B, C, H, W = 2, 8, 16, 16
    key = jax.random.PRNGKey(0)
    kx, kp = jax.random.split(key)

    x = jax.random.normal(kx, (B, C, H, W), jnp.float32)
    params = make_params(kp, C)

    ref = jax.block_until_ready(block_ref(x, params))
    out = jax.block_until_ready(block_pallas(x, params))

    np.testing.assert_allclose(np.asarray(out), np.asarray(ref),
                               rtol=1e-4, atol=1e-4)

    print("KERNEL_OK")
</pallas_src>

<mosaic_0001>
module attributes {stable_mosaic.version = 11 : i64} {
  func.func @_block_kernel(%arg0: memref<2x8x256xf32, #tpu.memory_space<vmem>>, %arg1: memref<8x8xf32, #tpu.memory_space<vmem>>, %arg2: memref<8x1xf32, #tpu.memory_space<vmem>>, %arg3: memref<8x8xf32, #tpu.memory_space<vmem>>, %arg4: memref<8x1xf32, #tpu.memory_space<vmem>>, %arg5: memref<8x72xf32, #tpu.memory_space<vmem>>, %arg6: memref<8x1xf32, #tpu.memory_space<vmem>>, %arg7: memref<8x8xf32, #tpu.memory_space<vmem>>, %arg8: memref<8x1xf32, #tpu.memory_space<vmem>>, %arg9: memref<9x512xf32, #tpu.memory_space<vmem>>, %arg10: memref<2x8x256xf32, #tpu.memory_space<vmem>>, %arg11: memref<72x512xf32, #tpu.memory_space<vmem>>) attributes {dimension_semantics = [], scalar_prefetch = 0 : i64, scratch_operands = 1 : i64, tpu.core_type = #tpu.core_type<tc>} {
    %c0 = arith.constant 0 : index
    %c0_0 = arith.constant 0 : index
    %c0_1 = arith.constant 0 : index
    %0 = vector.load %arg0[%c0, %c0_0, %c0_1] : memref<2x8x256xf32, #tpu.memory_space<vmem>>, vector<1x8x256xf32>
    %1 = vector.shape_cast %0 : vector<1x8x256xf32> to vector<8x256xf32>
    %c1 = arith.constant 1 : index
    %c0_2 = arith.constant 0 : index
    %c0_3 = arith.constant 0 : index
    %2 = vector.load %arg0[%c1, %c0_2, %c0_3] : memref<2x8x256xf32, #tpu.memory_space<vmem>>, vector<1x8x256xf32>
    %3 = vector.shape_cast %2 : vector<1x8x256xf32> to vector<8x256xf32>
    %4 = tpu.concatenate %1, %3 in 1 : vector<8x256xf32>, vector<8x256xf32> -> vector<8x512xf32>
    %c0_4 = arith.constant 0 : index
    %c0_5 = arith.constant 0 : index
    %5 = vector.load %arg1[%c0_4, %c0_5] : memref<8x8xf32, #tpu.memory_space<vmem>>, vector<8x8xf32>
    %cst = arith.constant dense<0.000000e+00> : vector<8x512xf32>
    %6 = tpu.matmul %5, %4, %cst {dimension_numbers = #tpu.dot_dimension_numbers<[1], [0], [0], [1], [0, 0, 1, 1], [], []>} : vector<8x8xf32>, vector<8x512xf32>, vector<8x512xf32> -> vector<8x512xf32>
    %c0_6 = arith.constant 0 : index
    %c0_7 = arith.constant 0 : index
    %7 = vector.load %arg2[%c0_6, %c0_7] : memref<8x1xf32, #tpu.memory_space<vmem>>, vector<8x1xf32>
    %8 = vector.broadcast %7 : vector<8x1xf32> to vector<8x512xf32>
    %9 = arith.addf %6, %8 : vector<8x512xf32>
    %c0_8 = arith.constant 0 : index
    %c0_9 = arith.constant 0 : index
    %10 = vector.load %arg3[%c0_8, %c0_9] : memref<8x8xf32, #tpu.memory_space<vmem>>, vector<8x8xf32>
    %cst_10 = arith.constant dense<0.000000e+00> : vector<8x512xf32>
    %11 = tpu.matmul %10, %4, %cst_10 {dimension_numbers = #tpu.dot_dimension_numbers<[1], [0], [0], [1], [0, 0, 1, 1], [], []>} : vector<8x8xf32>, vector<8x512xf32>, vector<8x512xf32> -> vector<8x512xf32>
    %c0_11 = arith.constant 0 : index
    %c0_12 = arith.constant 0 : index
    %12 = vector.load %arg4[%c0_11, %c0_12] : memref<8x1xf32, #tpu.memory_space<vmem>>, vector<8x1xf32>
    %13 = vector.broadcast %12 : vector<8x1xf32> to vector<8x512xf32>
    %14 = arith.addf %11, %13 : vector<8x512xf32>
    %cst_13 = arith.constant 0.000000e+00 : f32
    %15 = vector.broadcast %cst_13 : f32 to vector<8x512xf32>
    %16 = arith.maximumf %14, %15 : vector<8x512xf32>
    %c17_i32 = arith.constant 17 : i32
    %17 = tpu.dynamic_rotate %16 by %c17_i32 dim 1 : vector<8x512xf32>, i32 -> vector<8x512xf32>
    %c0_14 = arith.constant 0 : index
    %c0_15 = arith.constant 0 : index
    %18 = vector.load %arg9[%c0_14, %c0_15] : memref<9x512xf32, #tpu.memory_space<vmem>>, vector<1x512xf32>
    %19 = vector.broadcast %18 : vector<1x512xf32> to vector<8x512xf32>
    %20 = arith.mulf %17, %19 : vector<8x512xf32>
    %c0_16 = arith.constant 0 : index
    %c0_17 = arith.constant 0 : index
    %21 = vector.load %arg11[%c0_16, %c0_17] : memref<72x512xf32, #tpu.memory_space<vmem>>, vector<8x512xf32>
    tpu.vector_store %arg11[%c0_16, %c0_17], %20 {strides = array<i32>} : memref<72x512xf32, #tpu.memory_space<vmem>>, vector<8x512xf32>,
    %c16_i32 = arith.constant 16 : i32
    %22 = tpu.dynamic_rotate %16 by %c16_i32 dim 1 : vector<8x512xf32>, i32 -> vector<8x512xf32>
    %c1_18 = arith.constant 1 : index
    %c0_19 = arith.constant 0 : index
    %23 = vector.load %arg9[%c1_18, %c0_19] : memref<9x512xf32, #tpu.memory_space<vmem>>, vector<1x512xf32>
    %24 = vector.broadcast %23 : vector<1x512xf32> to vector<8x512xf32>
    %25 = arith.mulf %22, %24 : vector<8x512xf32>
    %c8 = arith.constant 8 : index
    %c0_20 = arith.constant 0 : index
    %26 = vector.load %arg11[%c8, %c0_20] : memref<72x512xf32, #tpu.memory_space<vmem>>, vector<8x512xf32>
    tpu.vector_store %arg11[%c8, %c0_20], %25 {strides = array<i32>} : memref<72x512xf32, #tpu.memory_space<vmem>>, vector<8x512xf32>,
    %c15_i32 = arith.constant 15 : i32
    %27 = tpu.dynamic_rotate %16 by %c15_i32 dim 1 : vector<8x512xf32>, i32 -> vector<8x512xf32>
    %c2 = arith.constant 2 : index
    %c0_21 = arith.constant 0 : index
    %28 = vector.load %arg9[%c2, %c0_21] : memref<9x512xf32, #tpu.memory_space<vmem>>, vector<1x512xf32>
    %29 = vector.broadcast %28 : vector<1x512xf32> to vector<8x512xf32>
    %30 = arith.mulf %27, %29 : vector<8x512xf32>
    %c16 = arith.constant 16 : index
    %c0_22 = arith.constant 0 : index
    %31 = vector.load %arg11[%c16, %c0_22] : memref<72x512xf32, #tpu.memory_space<vmem>>, vector<8x512xf32>
    tpu.vector_store %arg11[%c16, %c0_22], %30 {strides = array<i32>} : memref<72x512xf32, #tpu.memory_space<vmem>>, vector<8x512xf32>,
    %c1_i32 = arith.constant 1 : i32
    %32 = tpu.dynamic_rotate %16 by %c1_i32 dim 1 : vector<8x512xf32>, i32 -> vector<8x512xf32>
    %c3 = arith.constant 3 : index
    %c0_23 = arith.constant 0 : index
    %33 = vector.load %arg9[%c3, %c0_23] : memref<9x512xf32, #tpu.memory_space<vmem>>, vector<1x512xf32>
    %34 = vector.broadcast %33 : vector<1x512xf32> to vector<8x512xf32>
    %35 = arith.mulf %32, %34 : vector<8x512xf32>
    %c24 = arith.constant 24 : index
    %c0_24 = arith.constant 0 : index
    %36 = vector.load %arg11[%c24, %c0_24] : memref<72x512xf32, #tpu.memory_space<vmem>>, vector<8x512xf32>
    tpu.vector_store %arg11[%c24, %c0_24], %35 {strides = array<i32>} : memref<72x512xf32, #tpu.memory_space<vmem>>, vector<8x512xf32>,
    %c4 = arith.constant 4 : index
    %c0_25 = arith.constant 0 : index
    %37 = vector.load %arg9[%c4, %c0_25] : memref<9x512xf32, #tpu.memory_space<vmem>>, vector<1x512xf32>
    %38 = vector.broadcast %37 : vector<1x512xf32> to vector<8x512xf32>
    %39 = arith.mulf %16, %38 : vector<8x512xf32>
    %c32 = arith.constant 32 : index
    %c0_26 = arith.constant 0 : index
    %40 = vector.load %arg11[%c32, %c0_26] : memref<72x512xf32, #tpu.memory_space<vmem>>, vector<8x512xf32>
    tpu.vector_store %arg11[%c32, %c0_26], %39 {strides = array<i32>} : memref<72x512xf32, #tpu.memory_space<vmem>>, vector<8x512xf32>,
    %c511_i32 = arith.constant 511 : i32
    %41 = tpu.dynamic_rotate %16 by %c511_i32 dim 1 : vector<8x512xf32>, i32 -> vector<8x512xf32>
    %c5 = arith.constant 5 : index
    %c0_27 = arith.constant 0 : index
    %42 = vector.load %arg9[%c5, %c0_27] : memref<9x512xf32, #tpu.memory_space<vmem>>, vector<1x512xf32>
    %43 = vector.broadcast %42 : vector<1x512xf32> to vector<8x512xf32>
    %44 = arith.mulf %41, %43 : vector<8x512xf32>
    %c40 = arith.constant 40 : index
    %c0_28 = arith.constant 0 : index
    %45 = vector.load %arg11[%c40, %c0_28] : memref<72x512xf32, #tpu.memory_space<vmem>>, vector<8x512xf32>
    tpu.vector_store %arg11[%c40, %c0_28], %44 {strides = array<i32>} : memref<72x512xf32, #tpu.memory_space<vmem>>, vector<8x512xf32>,
    %c497_i32 = arith.constant 497 : i32
    %46 = tpu.dynamic_rotate %16 by %c497_i32 dim 1 : vector<8x512xf32>, i32 -> vector<8x512xf32>
    %c6 = arith.constant 6 : index
    %c0_29 = arith.constant 0 : index
    %47 = vector.load %arg9[%c6, %c0_29] : memref<9x512xf32, #tpu.memory_space<vmem>>, vector<1x512xf32>
    %48 = vector.broadcast %47 : vector<1x512xf32> to vector<8x512xf32>
    %49 = arith.mulf %46, %48 : vector<8x512xf32>
    %c48 = arith.constant 48 : index
    %c0_30 = arith.constant 0 : index
    %50 = vector.load %arg11[%c48, %c0_30] : memref<72x512xf32, #tpu.memory_space<vmem>>, vector<8x512xf32>
    tpu.vector_store %arg11[%c48, %c0_30], %49 {strides = array<i32>} : memref<72x512xf32, #tpu.memory_space<vmem>>, vector<8x512xf32>,
    %c496_i32 = arith.constant 496 : i32
    %51 = tpu.dynamic_rotate %16 by %c496_i32 dim 1 : vector<8x512xf32>, i32 -> vector<8x512xf32>
    %c7 = arith.constant 7 : index
    %c0_31 = arith.constant 0 : index
    %52 = vector.load %arg9[%c7, %c0_31] : memref<9x512xf32, #tpu.memory_space<vmem>>, vector<1x512xf32>
    %53 = vector.broadcast %52 : vector<1x512xf32> to vector<8x512xf32>
    %54 = arith.mulf %51, %53 : vector<8x512xf32>
    %c56 = arith.constant 56 : index
    %c0_32 = arith.constant 0 : index
    %55 = vector.load %arg11[%c56, %c0_32] : memref<72x512xf32, #tpu.memory_space<vmem>>, vector<8x512xf32>
    tpu.vector_store %arg11[%c56, %c0_32], %54 {strides = array<i32>} : memref<72x512xf32, #tpu.memory_space<vmem>>, vector<8x512xf32>,
    %c495_i32 = arith.constant 495 : i32
    %56 = tpu.dynamic_rotate %16 by %c495_i32 dim 1 : vector<8x512xf32>, i32 -> vector<8x512xf32>
    %c8_33 = arith.constant 8 : index
    %c0_34 = arith.constant 0 : index
    %57 = vector.load %arg9[%c8_33, %c0_34] : memref<9x512xf32, #tpu.memory_space<vmem>>, vector<1x512xf32>
    %58 = vector.broadcast %57 : vector<1x512xf32> to vector<8x512xf32>
    %59 = arith.mulf %56, %58 : vector<8x512xf32>
    %c64 = arith.constant 64 : index
    %c0_35 = arith.constant 0 : index
    %60 = vector.load %arg11[%c64, %c0_35] : memref<72x512xf32, #tpu.memory_space<vmem>>, vector<8x512xf32>
    tpu.vector_store %arg11[%c64, %c0_35], %59 {strides = array<i32>} : memref<72x512xf32, #tpu.memory_space<vmem>>, vector<8x512xf32>,
    %c0_36 = arith.constant 0 : index
    %c0_37 = arith.constant 0 : index
    %61 = vector.load %arg5[%c0_36, %c0_37] : memref<8x72xf32, #tpu.memory_space<vmem>>, vector<8x72xf32>
    %c0_38 = arith.constant 0 : index
    %c0_39 = arith.constant 0 : index
    %62 = vector.load %arg11[%c0_38, %c0_39] : memref<72x512xf32, #tpu.memory_space<vmem>>, vector<72x512xf32>
    %cst_40 = arith.constant dense<0.000000e+00> : vector<8x512xf32>
    %63 = tpu.matmul %61, %62, %cst_40 {dimension_numbers = #tpu.dot_dimension_numbers<[1], [0], [0], [1], [0, 0, 1, 1], [], []>} : vector<8x72xf32>, vector<72x512xf32>, vector<8x512xf32> -> vector<8x512xf32>
    %c0_41 = arith.constant 0 : index
    %c0_42 = arith.constant 0 : index
    %64 = vector.load %arg6[%c0_41, %c0_42] : memref<8x1xf32, #tpu.memory_space<vmem>>, vector<8x1xf32>
    %65 = vector.broadcast %64 : vector<8x1xf32> to vector<8x512xf32>
    %66 = arith.addf %63, %65 : vector<8x512xf32>
    %cst_43 = arith.constant 0.000000e+00 : f32
    %67 = vector.broadcast %cst_43 : f32 to vector<8x512xf32>
    %68 = arith.maximumf %66, %67 : vector<8x512xf32>
    %c0_44 = arith.constant 0 : index
    %c0_45 = arith.constant 0 : index
    %69 = vector.load %arg7[%c0_44, %c0_45] : memref<8x8xf32, #tpu.memory_space<vmem>>, vector<8x8xf32>
    %cst_46 = arith.constant dense<0.000000e+00> : vector<8x512xf32>
    %70 = tpu.matmul %69, %68, %cst_46 {dimension_numbers = #tpu.dot_dimension_numbers<[1], [0], [0], [1], [0, 0, 1, 1], [], []>} : vector<8x8xf32>, vector<8x512xf32>, vector<8x512xf32> -> vector<8x512xf32>
    %c0_47 = arith.constant 0 : index
    %c0_48 = arith.constant 0 : index
    %71 = vector.load %arg8[%c0_47, %c0_48] : memref<8x1xf32, #tpu.memory_space<vmem>>, vector<8x1xf32>
    %72 = vector.broadcast %71 : vector<8x1xf32> to vector<8x512xf32>
    %73 = arith.addf %70, %72 : vector<8x512xf32>
    %cst_49 = arith.constant 0.000000e+00 : f32
    %74 = vector.broadcast %cst_49 : f32 to vector<8x512xf32>
    %75 = arith.maximumf %73, %74 : vector<8x512xf32>
    %76 = arith.addf %75, %9 : vector<8x512xf32>
    %cst_50 = arith.constant 0.000000e+00 : f32
    %77 = vector.broadcast %cst_50 : f32 to vector<8x512xf32>
    %78 = arith.maximumf %76, %77 : vector<8x512xf32>
    %79 = vector.extract_strided_slice %78 {offsets = [0, 0], sizes = [8, 256], strides = [1, 1]} : vector<8x512xf32> to vector<8x256xf32>
    %c0_51 = arith.constant 0 : index
    %c0_52 = arith.constant 0 : index
    %c0_53 = arith.constant 0 : index
    %80 = vector.load %arg10[%c0_51, %c0_52, %c0_53] : memref<2x8x256xf32, #tpu.memory_space<vmem>>, vector<1x8x256xf32>
    %81 = vector.shape_cast %80 : vector<1x8x256xf32> to vector<8x256xf32>
    %82 = vector.shape_cast %79 : vector<8x256xf32> to vector<1x8x256xf32>
    tpu.vector_store %arg10[%c0_51, %c0_52, %c0_53], %82 {strides = array<i32>} : memref<2x8x256xf32, #tpu.memory_space<vmem>>, vector<1x8x256xf32>,
    %83 = vector.extract_strided_slice %78 {offsets = [0, 256], sizes = [8, 256], strides = [1, 1]} : vector<8x512xf32> to vector<8x256xf32>
    %c1_54 = arith.constant 1 : index
    %c0_55 = arith.constant 0 : index
    %c0_56 = arith.constant 0 : index
    %84 = vector.load %arg10[%c1_54, %c0_55, %c0_56] : memref<2x8x256xf32, #tpu.memory_space<vmem>>, vector<1x8x256xf32>
    %85 = vector.shape_cast %84 : vector<1x8x256xf32> to vector<8x256xf32>
    %86 = vector.shape_cast %83 : vector<8x256xf32> to vector<1x8x256xf32>
    tpu.vector_store %arg10[%c1_54, %c0_55, %c0_56], %86 {strides = array<i32>} : memref<2x8x256xf32, #tpu.memory_space<vmem>>, vector<1x8x256xf32>,
    return
  }
}

</mosaic_0001>

<bundles_post_ra>
// kernel: tpu_custom_call.1
= control target key start
LH: loop header
LB: loop body
LE: loop exit
PB: predicated region body
PF: predicated region fallthrough
CT: control target
= control target key end

     0   :  { %15 = vsyncpa [#allocation4], 0  ;;  %s1365_s0 = inlined_call_operand.vmem [shape: f32[2,8,256], index: 0, kind: input, shape index: {}]   ;;  %s1366_s1 = inlined_call_operand.hbm [shape: f32[8,8], index: 1, kind: input, shape index: {}]   ;;  %s1367_s2 = inlined_call_operand.vmem [shape: f32[8,1], index: 2, kind: input, shape index: {}]   ;;  %s1368_s3 = inlined_call_operand.hbm [shape: f32[8,8], index: 3, kind: input, shape index: {}]   ;;  %s1369_s4 = inlined_call_operand.vmem [shape: f32[8,1], index: 4, kind: input, shape index: {}]   ;;  %s1370_s5 = inlined_call_operand.vmem [shape: f32[8,72], index: 5, kind: input, shape index: {}]   ;;  %s1371_s6 = inlined_call_operand.vmem [shape: f32[8,1], index: 6, kind: input, shape index: {}]   ;;  %s1372_s7 = inlined_call_operand.hbm [shape: f32[8,8], index: 7, kind: input, shape index: {}]   ;;  %s1373_s8 = inlined_call_operand.vmem [shape: f32[8,1], index: 8, kind: input, shape index: {}]   ;;  %s1374_s9 = inlined_call_operand.hbm [shape: f32[9,512], index: 9, kind: input, shape index: {}]   ;;  %s1375_s10 = inlined_call_operand.hbm [shape: f32[2,8,256], index: 10, kind: output, shape index: {}]  }
   0x1   :  { %16 = vsyncpa [#allocation7], 0 }
   0x2   :  { %17 = vsyncpa [#allocation10], 0  ;;  %s39_s15 = sshll.u32 %s1368_s3, 4  ;;  %s40_s15 = int_to_ptr.hbm [resolvable:$true] %s39_s15 }
   0x3   :  { %18 = vsyncpa [#allocation5], 0  ;;  %s984_s16 = smov [#allocation6]   ;;  %s26_s20 = sshll.u32 %s1366_s1, 4  ;;  %s27_s20 = int_to_ptr.hbm [resolvable:$true] %s26_s20 }
   0x4   :  { %s41_s17 = sshll.u32 %s984_s16, 4  ;;  %s985_s21 = smov [#allocation3]   ;;  %s42_s17 = int_to_ptr.vmem [resolvable:$true] %s41_s17 }
   0x5   :  { %44 = dma.hbm_to_vmem [thread:$0]  %s40_s15, 128, %s42_s17, [#allocation7]  }
   0x6   :  { %s28_s22 = sshll.u32 %s985_s21, 4  ;;  %s56_s25 = sshll.u32 %s1372_s7, 4  ;;  %s29_s22 = int_to_ptr.vmem [resolvable:$true] %s28_s22  ;;  %s57_s25 = int_to_ptr.hbm [resolvable:$true] %s56_s25 }
   0x7   :  { %31 = dma.hbm_to_vmem [thread:$0]  %s27_s20, 128, %s29_s22, [#allocation4]  }
   0x8   :  { %s68_s27 = sshll.u32 %s1374_s9, 4  ;;  %s986_s28 = smov [#allocation8]   ;;  %s69_s27 = int_to_ptr.hbm [resolvable:$true] %s68_s27 }
   0x9   :  { %s58_s29 = sshll.u32 %s986_s28, 4  ;;  %s987_s1 = smov [#allocation9]   ;;  %s59_s29 = int_to_ptr.vmem [resolvable:$true] %s58_s29 }
   0xa   :  { %61 = dma.hbm_to_vmem [thread:$0]  %s57_s25, 128, %s59_s29, [#allocation7]  }
   0xb   :  { %s70_s30 = sshll.u32 %s987_s1, 4  ;;  %s988_s11 = smov 512   ;;  %s71_s30 = int_to_ptr.vmem [resolvable:$true] %s70_s30 }
   0xc   :  { %s989_s12 = smov 32  }
   0xd   :  { %76 = dma.hbm_to_vmem [thread:$0]  %s69_s27, 1024, %s71_s30, [#allocation10], %s988_s11, %s988_s11, %s989_s12  }
   0xe   :  { %976 = dma.done.wait [#allocation4], 128  }
   0xf   :  { %977 = vsyncadd [#allocation4], 4294967168 }
  0x10   :  { %978 = dma.done.wait [#allocation7], 256  }
  0x11   :  { %979 = vsyncadd [#allocation7], 4294967040 }
  0x12   :  { %980 = dma.done.wait [#allocation10], 1024  }
  0x13   :  { %981 = vsyncadd [#allocation10], 4294966272  ;;  %v990_v0 = vmov 0   ;;  %v93_v1 = vld [vmem:[%s1365_s0] sm:$0xff]  ;;  %v94_v2 = vld [vmem:[%s1365_s0 + $0x8] sm:$0xff]  ;;  %vm105_vm0 = vcmask 64512   ;;  %v291_v38 = vlaneseq }
  0x14   :  { %853 = vset.pattern.permute.xlu0 %v990_v0  ;;  %855 = vset.pattern.permute.xlu2 %v990_v0  ;;  %v818_v3 = vld [vmem:[%s1365_s0 + $0x10] sm:$0xff]  ;;  %v819_v4 = vld [vmem:[%s1365_s0 + $0x18] sm:$0xff]  ;;  %v98_v5 = vld [vmem:[#allocation3] sm:$0xff]  ;;  %s991_s0 = smov 113   ;;  %s993_s21 = smov 111   ;;  %vm602_vm9 = vcmask 588800  }
  0x15   :  { %854 = vset.pattern.permute.xlu1 %v990_v0  ;;  %124 = vmatpush.msra.mxu0 %v93_v1  ;;  %v190_v6 = vld [vmem:[%s1369_s4] sm:$0xff]  ;;  %v189_v7 = vld [vmem:[#allocation6] sm:$0xff]  ;;  %s992_s4 = smov 112   ;;  %s994_s22 = smov 127   ;;  %v1179_v41 = vand.u32 127, %v291_v38 }
  0x16   :  { %144 = vmatpush.msra.mxu1 %v94_v2  ;;  %164 = vmatpush.msra.mxu2 %v818_v3  ;;  %s995_s23 = smov 16   ;;  %s996_s24 = smov 17   ;;  %v596_v25 = vld [vmem:[%s1371_s6] sm:$0xff] }
  0x17   :  { %184 = vmatpush.msra.mxu3 %v819_v4  ;;  %820 = vmatmul.msk.f32.vlgmr.msra.gmra.mxu0 %vm105_vm0, %v98_v5  ;;  %s997_s25 = smov 1   ;;  %s998_s3 = smov 15   ;;  %v99_v26 = vld [vmem:[%s1367_s2] sm:$0xff]  ;;  %vm503_vm1 = vcmp.lt.s32.totalorder %v1179_v41, 112  ;;  %vm535_vm2 = vcmp.lt.s32.totalorder %v1179_v41, 111  ;;  %vm471_vm3 = vcmp.lt.s32.totalorder %v1179_v41, 113 }
  0x18   :  { %821 = vmatmul.msk.f32.vlgmr.msra.gmra.mxu1 %vm105_vm0, %v98_v5  ;;  %822 = vmatmul.msk.f32.vlgmr.msra.gmra.mxu2 %vm105_vm0, %v98_v5  ;;  %v541_v42 = vld [vmem:[#allocation9 + $0x20] ss:$8 sm:$0xf]  ;;  %v509_v44 = vld [vmem:[#allocation9 + $0x7] ss:$8 sm:$0xf] }
  0x19   :  { %823 = vmatmul.msk.f32.vlgmr.msra.gmra.mxu3 %vm105_vm0, %v98_v5  ;;  %214 = vmatpush.msrb.mxu0 %v93_v1  ;;  %v543_v45 = vperm.slane %v541_v42, 0  ;;  %v511_v46 = vperm.slane %v509_v44, 0  ;;  %v544_v54 = vperm.slane %v541_v42, 1  ;;  %v512_v55 = vperm.slane %v509_v44, 1  ;;  %s803_s7 = sshll.u32 %s1375_s10, 4  ;;  %s1000_s9 = smov 256   ;;  %s804_s7 = int_to_ptr.hbm [resolvable:$true] %s803_s7 }
  0x1a   :  { %234 = vmatpush.msrb.mxu1 %v94_v2  ;;  %254 = vmatpush.msrb.mxu2 %v818_v3  ;;  %v1197_v62 = vld [vmem:[#allocation9 + $0x6] ss:$8 sm:$0xf]  ;;  %v545_v63 = vperm.slane %v541_v42, 2  ;;  %v546_v0 = vperm.slane %v541_v42, 3  ;;  %v513_v1 = vperm.slane %v509_v44, 2 }
  0x1b   :  { %274 = vmatpush.msrb.mxu3 %v819_v4  ;;  %193 = vperm.xlu0 %853, %v190_v6   ;;  %v514_v2 = vperm.slane %v509_v44, 3  ;;  %v481_v3 = vperm.slane %v1197_v62, 2  ;;  %vm439_vm4 = vcmp.lt.s32.totalorder %v1179_v41, 127  ;;  %vm388_vm5 = vcmp.lt.s32.totalorder %v1179_v41, 1 }
  0x1c   :  { %vm356_vm6 = vcmp.lt.s32.totalorder %v1179_v41, 15  ;;  %vm324_vm7 = vcmp.lt.s32.totalorder %v1179_v41, 16  ;;  %vm293_vm8 = vcmp.lt.s32.totalorder %v1179_v41, 17 }
  0x1f   :  { %824 = vmatmul.msk.f32.vlgmr.msrb.gmra.mxu0 %vm105_vm0, %v189_v7 }
  0x20   :  { %825 = vmatmul.msk.f32.vlgmr.msrb.gmra.mxu1 %vm105_vm0, %v189_v7  ;;  %826 = vmatmul.msk.f32.vlgmr.msrb.gmra.mxu2 %vm105_vm0, %v189_v7 }
  0x21   :  { %827 = vmatmul.msk.f32.vlgmr.msrb.gmra.mxu3 %vm105_vm0, %v189_v7 }
  0x8d   :  { %v194_v10 = vpop.permute.xlu0 %193 }
  0x94   :  { %v1091_v8 = vpop.f32.mrf.mxu0 }
  0x95   :  { %v1093_v9 = vpop.f32.mrf.mxu1 }
  0x9b   :  { %v1104_v17 = vpop.f32.mrf.mxu2 }
  0x9c   :  { %v216_v11 = vpop.f32.mrf.mxu0  ;;  %v1095_v13 = vpop.f32.mrf.mxu3 }
  0x9d   :  { %v217_v12 = vadd.f32 %v216_v11, %v194_v10  ;;  %v236_v15 = vpop.f32.mrf.mxu1 }
  0x9e   :  { %v237_v16 = vadd.f32 %v236_v15, %v194_v10 }
  0x9f   :  { %v1097_v14 = vmax.f32 %v217_v12, 0.0 }
  0xa0   :  { %v1106_v18 = vmax.f32 %v237_v16, 0.0  ;;  %v482_v16 = vperm.slane %v1197_v62, 3 }
  0xa1   :  { %463 = vrot.lane.b32.xlu1 %v1097_v14, %s991_s0  ;;  %495 = vrot.lane.b32.xlu2 %v1097_v14, %s992_s4 }
  0xa2   :  { %527 = vrot.lane.b32.xlu0 %v1097_v14, %s993_s21 }
  0xa3   :  { %v256_v21 = vpop.f32.mrf.mxu2 }
  0xa4   :  { %v276_v19 = vpop.f32.mrf.mxu3  ;;  %v257_v23 = vadd.f32 %v256_v21, %v194_v10 }
  0xa5   :  { %v277_v20 = vadd.f32 %v276_v19, %v194_v10  ;;  %v1205_v10 = vld [vmem:[#allocation9 + $0x5] ss:$8 sm:$0xf] }
  0xa6   :  { %v1119_v24 = vmax.f32 %v257_v23, 0.0 }
  0xa7   :  { %v1114_v22 = vmax.f32 %v277_v20, 0.0 }
  0xa9   :  { %431 = vrot.lane.b32.xlu1 %v1097_v14, %s994_s22  ;;  %318 = vrot.lane.b32.xlu2 %v1106_v18, %s995_s23 }
  0xaa   :  { %285 = vrot.lane.b32.xlu0 %v1106_v18, %s996_s24 }
  0xb1   :  { %382 = vrot.lane.b32.xlu1 %v1106_v18, %s997_s25  ;;  %497 = vrot.lane.b32.xlu2 %v1106_v18, %s992_s4 }
  0xb2   :  { %501 = vrot.lane.b32.xlu0 %v1114_v22, %s992_s4 }
  0xb9   :  { %350 = vrot.lane.b32.xlu1 %v1106_v18, %s998_s3  ;;  %499 = vrot.lane.b32.xlu2 %v1119_v24, %s992_s4 }
  0xba   :  { %469 = vrot.lane.b32.xlu0 %v1114_v22, %s991_s0 }
  0xc1   :  { %529 = vrot.lane.b32.xlu1 %v1106_v18, %s993_s21  ;;  %467 = vrot.lane.b32.xlu2 %v1119_v24, %s991_s0 }
  0xc2   :  { %437 = vrot.lane.b32.xlu0 %v1114_v22, %s994_s22 }
  0xc9   :  { %531 = vrot.lane.b32.xlu1 %v1119_v24, %s993_s21  ;;  %435 = vrot.lane.b32.xlu2 %v1119_v24, %s994_s22 }
  0xca   :  { %386 = vrot.lane.b32.xlu0 %v1114_v22, %s997_s25 }
  0xd1   :  { %533 = vrot.lane.b32.xlu1 %v1114_v22, %s993_s21  ;;  %384 = vrot.lane.b32.xlu2 %v1119_v24, %s997_s25 }
  0xd2   :  { %354 = vrot.lane.b32.xlu0 %v1114_v22, %s998_s3 }
  0xd9   :  { %322 = vrot.lane.b32.xlu1 %v1114_v22, %s995_s23  ;;  %352 = vrot.lane.b32.xlu2 %v1119_v24, %s998_s3 }
  0xda   :  { %320 = vrot.lane.b32.xlu0 %v1119_v24, %s995_s23 }
  0xe1   :  { %287 = vrot.lane.b32.xlu1 %v1119_v24, %s996_s24  ;;  %289 = vrot.lane.b32.xlu2 %v1114_v22, %s996_s24 }
  0xe2   :  { %465 = vrot.lane.b32.xlu0 %v1106_v18, %s991_s0 }
  0xe9   :  { %433 = vrot.lane.b32.xlu1 %v1106_v18, %s994_s22  ;;  %380 = vrot.lane.b32.xlu2 %v1097_v14, %s997_s25 }
  0xea   :  { %348 = vrot.lane.b32.xlu0 %v1097_v14, %s998_s3 }
  0xf1   :  { %316 = vrot.lane.b32.xlu1 %v1097_v14, %s995_s23  ;;  %283 = vrot.lane.b32.xlu2 %v1097_v14, %s996_s24 }
  0xf2   :  { %599 = vperm.xlu0 %853, %v596_v25  }
  0xf9   :  { %102 = vperm.xlu2 %855, %v99_v26  }
  0xfb   :  { %v496_v27 = vpop.permute.xlu2 %495 }
 0x103   :  { %v1165_v28 = vpop.permute.xlu2 %318 }
 0x10b   :  { %v498_v29 = vpop.permute.xlu2 %497 }
 0x10c   :  { %v506_v48 = vsel %vm503_vm1, %v496_v27, %v498_v29 }
 0x10d   :  { %v519_v52 = vmul.f32 %v511_v46, %v506_v48 }
 0x113   :  { %v1167_v30 = vpop.permute.xlu1 %463  ;;  %v500_v32 = vpop.permute.xlu2 %499 }
 0x114   :  { %v528_v31 = vpop.permute.xlu0 %527  ;;  %v505_v57 = vsel %vm503_vm1, %v498_v29, %v500_v32  ;;  %v1222_v29 = vld [vmem:[#allocation9 + $0x4] ss:$8 sm:$0xf] }
 0x115   :  { %v520_v61 = vmul.f32 %v512_v55, %v505_v57  ;;  %v417_v38 = vperm.slane %v1222_v29, 2  ;;  %v418_v46 = vperm.slane %v1222_v29, 3 }
 0x11b   :  { %v1169_v33 = vpop.permute.xlu1 %431  ;;  %v1175_v37 = vpop.permute.xlu2 %467 }
 0x11c   :  { %v1171_v34 = vpop.permute.xlu0 %285 }
 0x123   :  { %v1173_v35 = vpop.permute.xlu1 %382  ;;  %v1181_v43 = vpop.permute.xlu2 %435 }
 0x124   :  { %v502_v36 = vpop.permute.xlu0 %501 }
 0x125   :  { %v504_v6 = vsel %vm503_vm1, %v500_v32, %v502_v36  ;;  %v507_v7 = vsel %vm503_vm1, %v502_v36, %v496_v27  ;;  %v449_v27 = vperm.slane %v1205_v10, 2  ;;  %v450_v32 = vperm.slane %v1205_v10, 3 }
 0x126   :  { %v521_v25 = vmul.f32 %v513_v1, %v504_v6  ;;  %v522_v26 = vmul.f32 %v514_v2, %v507_v7 }
 0x12b   :  { %v1177_v39 = vpop.permute.xlu1 %350  ;;  %v1189_v53 = vpop.permute.xlu2 %384 }
 0x12c   :  { %v470_v40 = vpop.permute.xlu0 %469 }
 0x12d   :  { %v472_v21 = vsel %vm471_vm3, %v1175_v37, %v470_v40  ;;  %v475_v23 = vsel %vm471_vm3, %v470_v40, %v1167_v30 }
 0x12e   :  { %v489_v40 = vmul.f32 %v481_v3, %v472_v21  ;;  %v490_v42 = vmul.f32 %v482_v16, %v475_v23  ;;  %v480_v21 = vperm.slane %v1197_v62, 1 }
 0x133   :  { %v530_v47 = vpop.permute.xlu1 %529  ;;  %v353_v4 = vpop.permute.xlu2 %352 }
 0x134   :  { %v538_v49 = vsel %vm535_vm2, %v528_v31, %v530_v47  ;;  %v438_v50 = vpop.permute.xlu0 %437 }
 0x135   :  { %v551_v51 = vmul.f32 %v543_v45, %v538_v49  ;;  %v440_v36 = vsel %vm439_vm4, %v1181_v43, %v438_v50  ;;  %v443_v44 = vsel %vm439_vm4, %v438_v50, %v1169_v33  ;;  %v1235_v45 = vld [vmem:[#allocation9 + $0x2] ss:$8 sm:$0xf]  ;;  %v390_v50 = vsel %vm388_vm5, %v1173_v35, %v1189_v53 }
 0x136   :  { %v457_v48 = vmul.f32 %v449_v27, %v440_v36 }
 0x137   :  { %613 = vmatpush.msra.mxu0 %v551_v51  ;;  %v458_v51 = vmul.f32 %v450_v32, %v443_v44 }
 0x139   :  { %614 = vmatpush.msra.mxu0 %v519_v52 }
 0x13b   :  { %v532_v56 = vpop.permute.xlu1 %531  ;;  %v1250_v57 = vpop.permute.xlu2 %289 }
 0x13c   :  { %v537_v58 = vsel %vm535_vm2, %v530_v47, %v532_v56  ;;  %v1195_v59 = vpop.permute.xlu0 %386 }
 0x13d   :  { %v552_v60 = vmul.f32 %v544_v54, %v537_v58  ;;  %v1247_v54 = vld [vmem:[#allocation9 + $0x1] ss:$8 sm:$0xf]  ;;  %v389_v58 = vsel %vm388_vm5, %v1189_v53, %v1195_v59 }
 0x13e   :  { %v334_v53 = vperm.slane %v1247_v54, 2 }
 0x13f   :  { %633 = vmatpush.msra.mxu1 %v552_v60  ;;  %v425_v60 = vmul.f32 %v417_v38, %v1119_v24  ;;  %v335_v24 = vperm.slane %v1247_v54, 3  ;;  %v1290_v38 = vld [vmem:[%s1370_s5] sm:$0xff] }
 0x141   :  { %634 = vmatpush.msra.mxu1 %v520_v61  ;;  %v358_v61 = vsel %vm356_vm6, %v1177_v39, %v353_v4 }
 0x143   :  { %v534_v5 = vpop.permute.xlu1 %533 }
 0x144   :  { %v536_v11 = vsel %vm535_vm2, %v532_v56, %v534_v5  ;;  %v539_v12 = vsel %vm535_vm2, %v534_v5, %v528_v31  ;;  %v1211_v15 = vpop.permute.xlu0 %354  ;;  %v1224_v31 = vld [vmem:[#allocation9 + $0x3] ss:$8 sm:$0xf]  ;;  %v366_v56 = vperm.slane %v1235_v45, 2 }
 0x145   :  { %v553_v19 = vmul.f32 %v545_v63, %v536_v11  ;;  %v554_v20 = vmul.f32 %v546_v0, %v539_v12  ;;  %v398_v47 = vperm.slane %v1224_v31, 2  ;;  %v399_v52 = vperm.slane %v1224_v31, 3  ;;  %v1267_v5 = vld [vmem:[#allocation9] ss:$8 sm:$0xf] }
 0x146   :  { %v367_v63 = vperm.slane %v1235_v45, 3  ;;  %v426_v0 = vmul.f32 %v418_v46, %v1114_v22  ;;  %v357_v2 = vsel %vm356_vm6, %v353_v4, %v1211_v15  ;;  %v374_v7 = vmul.f32 %v366_v56, %v358_v61 }
 0x147   :  { %653 = vmatpush.msra.mxu2 %v553_v19  ;;  %673 = vmatpush.msra.mxu3 %v554_v20  ;;  %v406_v1 = vmul.f32 %v398_v47, %v390_v50  ;;  %v407_v3 = vmul.f32 %v399_v52, %v389_v58  ;;  %v302_v4 = vperm.slane %v1267_v5, 2  ;;  %v303_v11 = vperm.slane %v1267_v5, 3 }
 0x148   :  { %v375_v12 = vmul.f32 %v367_v63, %v357_v2  ;;  %v479_v20 = vperm.slane %v1197_v62, 0  ;;  %v447_v47 = vperm.slane %v1205_v10, 0  ;;  %v416_v50 = vperm.slane %v1222_v29, 1 }
 0x149   :  { %654 = vmatpush.msra.mxu2 %v521_v25  ;;  %674 = vmatpush.msra.mxu3 %v522_v26  ;;  %v365_v63 = vperm.slane %v1235_v45, 1 }
 0x14b   :  { %v1240_v49 = vpop.permute.xlu1 %322  ;;  %655 = vmatpush.msra.mxu2 %v489_v40  ;;  %675 = vmatpush.msra.mxu3 %v490_v42  ;;  %v381_v42 = vpop.permute.xlu2 %380 }
 0x14c   :  { %v321_v55 = vpop.permute.xlu0 %320  ;;  %v391_v61 = vsel %vm388_vm5, %v381_v42, %v1173_v35 }
 0x14d   :  { %656 = vmatpush.msra.mxu2 %v457_v48  ;;  %676 = vmatpush.msra.mxu3 %v458_v51  ;;  %v326_v6 = vsel %vm324_vm7, %v1165_v28, %v321_v55  ;;  %v325_v22 = vsel %vm324_vm7, %v321_v55, %v1240_v49  ;;  %v448_v48 = vperm.slane %v1205_v10, 1  ;;  %v396_v55 = vperm.slane %v1224_v31, 0 }
 0x14e   :  { %v342_v16 = vmul.f32 %v334_v53, %v326_v6  ;;  %v343_v23 = vmul.f32 %v335_v24, %v325_v22  ;;  %v397_v10 = vperm.slane %v1224_v31, 1  ;;  %v424_v31 = vmul.f32 %v416_v50, %v1106_v18 }
 0x14f   :  { %657 = vmatpush.msra.mxu2 %v425_v60  ;;  %677 = vmatpush.msra.mxu3 %v426_v0  ;;  %v333_v53 = vperm.slane %v1247_v54, 1  ;;  %v301_v18 = vperm.slane %v1267_v5, 1 }
 0x151   :  { %658 = vmatpush.msra.mxu2 %v406_v1  ;;  %678 = vmatpush.msra.mxu3 %v407_v3 }
 0x153   :  { %v288_v19 = vpop.permute.xlu1 %287  ;;  %659 = vmatpush.msra.mxu2 %v374_v7  ;;  %679 = vmatpush.msra.mxu3 %v375_v12  ;;  %v284_v2 = vpop.permute.xlu2 %283 }
 0x154   :  { %v294_v25 = vsel %vm293_vm8, %v288_v19, %v1250_v57  ;;  %v295_v26 = vsel %vm293_vm8, %v1171_v34, %v288_v19  ;;  %v466_v27 = vpop.permute.xlu0 %465  ;;  %v297_v6 = vsel %vm293_vm8, %v1250_v57, %v284_v2  ;;  %v690_v19 = vld [vmem:[#allocation8] sm:$0xff] }
 0x155   :  { %v310_v32 = vmul.f32 %v302_v4, %v295_v26  ;;  %v311_v36 = vmul.f32 %v303_v11, %v294_v25  ;;  %660 = vmatpush.msra.mxu2 %v342_v16  ;;  %v473_v62 = vsel %vm471_vm3, %v466_v27, %v1175_v37  ;;  %v474_v40 = vsel %vm471_vm3, %v1167_v30, %v466_v27 }
 0x156   :  { %680 = vmatpush.msra.mxu3 %v343_v23  ;;  %v487_v44 = vmul.f32 %v479_v20, %v474_v40  ;;  %v488_v46 = vmul.f32 %v480_v21, %v473_v62  ;;  %v415_v30 = vperm.slane %v1222_v29, 0  ;;  %v392_v29 = vsel %vm388_vm5, %v1195_v59, %v381_v42 }
 0x157   :  { %661 = vmatpush.msra.mxu2 %v310_v32  ;;  %v404_v1 = vmul.f32 %v396_v55, %v392_v29  ;;  %v405_v59 = vmul.f32 %v397_v10, %v391_v61 }
 0x158   :  { %681 = vmatpush.msra.mxu3 %v311_v36  ;;  %830 = vmatmul.msk.f32.vlgmr.msra.gmra.mxu2 %vm602_vm9, %v1290_v38 }
 0x159   :  { %615 = vmatpush.msra.mxu0 %v487_v44  ;;  %635 = vmatpush.msra.mxu1 %v488_v46 }
 0x15a   :  { %831 = vmatmul.msk.f32.vlgmr.msra.gmra.mxu3 %vm602_vm9, %v1290_v38 }
 0x15b   :  { %v434_v37 = vpop.permute.xlu1 %433 }
 0x15c   :  { %v441_v51 = vsel %vm439_vm4, %v434_v37, %v1181_v43  ;;  %v442_v52 = vsel %vm439_vm4, %v1169_v33, %v434_v37  ;;  %v349_v60 = vpop.permute.xlu0 %348  ;;  %v364_v43 = vperm.slane %v1235_v45, 0  ;;  %v423_v33 = vmul.f32 %v415_v30, %v1097_v14 }
 0x15d   :  { %v455_v56 = vmul.f32 %v447_v47, %v442_v52  ;;  %v456_v58 = vmul.f32 %v448_v48, %v441_v51  ;;  %v359_v0 = vsel %vm356_vm6, %v349_v60, %v1177_v39  ;;  %v360_v35 = vsel %vm356_vm6, %v1211_v15, %v349_v60 }
 0x15e   :  { %v332_v45 = vperm.slane %v1247_v54, 0  ;;  %v300_v14 = vperm.slane %v1267_v5, 0  ;;  %v372_v3 = vmul.f32 %v364_v43, %v360_v35  ;;  %v373_v24 = vmul.f32 %v365_v63, %v359_v0 }
 0x15f   :  { %616 = vmatpush.msra.mxu0 %v455_v56  ;;  %636 = vmatpush.msra.mxu1 %v456_v58  ;;  %v296_v15 = vsel %vm293_vm8, %v284_v2, %v1171_v34 }
 0x160   :  { %v308_v4 = vmul.f32 %v300_v14, %v297_v6  ;;  %v309_v11 = vmul.f32 %v301_v18, %v296_v15 }
 0x161   :  { %617 = vmatpush.msra.mxu0 %v423_v33  ;;  %637 = vmatpush.msra.mxu1 %v424_v31 }
 0x163   :  { %v317_v39 = vpop.permute.xlu1 %316  ;;  %638 = vmatpush.msra.mxu1 %v405_v59  ;;  %618 = vmatpush.msra.mxu0 %v404_v1 }
 0x164   :  { %v327_v54 = vsel %vm324_vm7, %v317_v39, %v1165_v28  ;;  %v328_v5 = vsel %vm324_vm7, %v1240_v49, %v317_v39  ;;  %v691_v28 = vld [vmem:[%s1373_s8] sm:$0xff]  ;;  %v600_v34 = vpop.permute.xlu0 %599  ;;  %s999_s8 = smov [#allocation11]  }
 0x165   :  { %v340_v7 = vmul.f32 %v332_v45, %v328_v5  ;;  %v341_v22 = vmul.f32 %v333_v53, %v327_v54  ;;  %619 = vmatpush.msra.mxu0 %v372_v3  ;;  %639 = vmatpush.msra.mxu1 %v373_v24  ;;  %s801_s30 = sshll.u32 %s999_s8, 4  ;;  %s802_s30 = int_to_ptr.vmem [resolvable:$true] %s801_s30 }
 0x166   :  { %694 = vperm.xlu1 %854, %v691_v28  }
 0x167   :  { %620 = vmatpush.msra.mxu0 %v340_v7  ;;  %640 = vmatpush.msra.mxu1 %v341_v22 }
 0x169   :  { %621 = vmatpush.msra.mxu0 %v308_v4  ;;  %641 = vmatpush.msra.mxu1 %v309_v11 }
 0x16a   :  { %828 = vmatmul.msk.f32.vlgmr.msra.gmra.mxu0 %vm602_vm9, %v1290_v38  ;;  %829 = vmatmul.msk.f32.vlgmr.msra.gmra.mxu1 %vm602_vm9, %v1290_v38  ;;  %v103_v38 = vpop.permute.xlu2 %102 }
 0x16b   :  { %v167_v44 = vadd.f32 %v1104_v17, %v103_v38  ;;  %v187_v48 = vadd.f32 %v1095_v13, %v103_v38  ;;  %v127_v58 = vadd.f32 %v1091_v8, %v103_v38  ;;  %v147_v60 = vadd.f32 %v1093_v9, %v103_v38 }
 0x1d8   :  { %v695_v36 = vpop.permute.xlu1 %694 }
 0x1db   :  { %v663_v41 = vpop.f32.mrf.mxu2 }
 0x1dc   :  { %v664_v49 = vadd.f32 %v663_v41, %v600_v34 }
 0x1dd   :  { %v683_v57 = vpop.f32.mrf.mxu3 }
 0x1de   :  { %v688_v12 = vmax.f32 %v664_v49, 0.0  ;;  %v684_v16 = vadd.f32 %v683_v57, %v600_v34 }
 0x1e0   :  { %v689_v20 = vmax.f32 %v684_v16, 0.0  ;;  %755 = vmatpush.msrb.mxu2 %v688_v12 }
 0x1e1   :  { %834 = vmatmul.msk.f32.vlgmr.msrb.gmra.mxu2 %vm105_vm0, %v690_v19 }
 0x1e2   :  { %775 = vmatpush.msrb.mxu3 %v689_v20 }
 0x1e3   :  { %835 = vmatmul.msk.f32.vlgmr.msrb.gmra.mxu3 %vm105_vm0, %v690_v19 }
 0x1e7   :  { %v623_v21 = vpop.f32.mrf.mxu0  ;;  %v643_v23 = vpop.f32.mrf.mxu1 }
 0x1e8   :  { %v624_v25 = vadd.f32 %v623_v21, %v600_v34  ;;  %v644_v26 = vadd.f32 %v643_v23, %v600_v34 }
 0x1ea   :  { %v686_v27 = vmax.f32 %v624_v25, 0.0  ;;  %v687_v32 = vmax.f32 %v644_v26, 0.0 }
 0x1ec   :  { %715 = vmatpush.msrb.mxu0 %v686_v27  ;;  %735 = vmatpush.msrb.mxu1 %v687_v32 }
 0x1ed   :  { %832 = vmatmul.msk.f32.vlgmr.msrb.gmra.mxu0 %vm105_vm0, %v690_v19  ;;  %833 = vmatmul.msk.f32.vlgmr.msrb.gmra.mxu1 %vm105_vm0, %v690_v19 }
 0x264   :  { %v757_v62 = vpop.f32.mrf.mxu2 }
 0x265   :  { %v758_v40 = vadd.f32 %v757_v62, %v695_v36 }
 0x266   :  { %v777_v42 = vpop.f32.mrf.mxu3 }
 0x267   :  { %v782_v46 = vmax.f32 %v758_v40, 0.0  ;;  %v778_v47 = vadd.f32 %v777_v42, %v695_v36 }
 0x269   :  { %v786_v37 = vadd.f32 %v782_v46, %v167_v44  ;;  %v783_v30 = vmax.f32 %v778_v47, 0.0 }
 0x26a   :  { %v717_v50 = vpop.f32.mrf.mxu0  ;;  %v737_v51 = vpop.f32.mrf.mxu1 }
 0x26b   :  { %v790_v52 = vmax.f32 %v786_v37, 0.0  ;;  %v787_v55 = vadd.f32 %v783_v30, %v187_v48  ;;  %v718_v10 = vadd.f32 %v717_v50, %v695_v36  ;;  %v738_v56 = vadd.f32 %v737_v51, %v695_v36 }
 0x26d   :  { %795 = vst [vmem:[#allocation11 + $0x10] sm:$0xff] %v790_v52  ;;  %v791_v61 = vmax.f32 %v787_v55, 0.0  ;;  %v780_v29 = vmax.f32 %v718_v10, 0.0  ;;  %v781_v17 = vmax.f32 %v738_v56, 0.0 }
 0x26f   :  { %796 = vst [vmem:[#allocation11 + $0x18] sm:$0xff] %v791_v61  ;;  %v784_v13 = vadd.f32 %v780_v29, %v127_v58  ;;  %v785_v43 = vadd.f32 %v781_v17, %v147_v60 }
 0x271   :  { %v788_v63 = vmax.f32 %v784_v13, 0.0  ;;  %v789_v33 = vmax.f32 %v785_v43, 0.0 }
 0x273   :  { %792 = vst [vmem:[#allocation11] sm:$0xff] %v788_v63 }
 0x274   :  { %793 = vst [vmem:[#allocation11 + $0x8] sm:$0xff] %v789_v33 }
 0x275   :  { %809 = dma.vmem_to_hbm [thread:$0]  %s802_s30, 512, %s804_s7, [#allocation5], %s1000_s9, %s1000_s9, %s995_s23  }
 0x276   :  { %982 = dma.done.wait [#allocation5], 512  }
 0x277   :  { %983 = vsyncadd [#allocation5], 4294966784 }
 0x278   :  { %814 = vsyncpa [#allocation4], 1 }
 0x279   :  { %815 = vsyncpa [#allocation7], 1 }
 0x27a   :  { %816 = vsyncpa [#allocation10], 1 }
 0x27b   :  { %817 = vsyncpa [#allocation5], 1 }

</bundles_post_ra>
